<compile_context>
chip_gen: v6e
topology: v6e:2x2x1
jax: 0.10.0
libtpu: 0.0.40
codegen_flags: <defaults>
</compile_context>

<pallas_src>
import math

import jax
import jax.numpy as jnp
from jax import lax
from jax.experimental import pallas as pl
from jax.experimental.pallas import tpu as pltpu


# ---------------------------------------------------------------------------
# Small helpers
# ---------------------------------------------------------------------------

def _round_up(a: int, b: int) -> int:
    return ((a + b - 1) // b) * b


def _sublane_unit(dtype) -> int:
    """Sublane packing granularity: 8 for 32-bit, 16 for 16-bit, 32 for 8-bit dtypes."""
    return max(8, 32 // jnp.dtype(dtype).itemsize)


def _pick_lane_tile(dim: int, target: int) -> int:
    """Tile for a lane (last-dim) axis.  Never requires padding of that operand:
    divisor-of-dim (multiple of 128) when dim % 128 == 0, else the full dim (legal block)."""
    if dim % 128 != 0:
        return dim
    t = max(128, (min(target, dim) // 128) * 128)
    while t > 128 and dim % t != 0:
        t -= 128
    return t


def _pick_row_tile(m: int, unit: int, target: int):
    """Tile + padded size for the row (second-to-last) axis of x / the output."""
    if m <= target:
        return m, m                              # single full block, zero padding
    m_u = _round_up(m, unit)
    cap = max(unit, (min(target, m_u) // unit) * unit)
    t = cap
    while t > unit and m_u % t != 0:
        t -= unit
    if m_u % t != 0:
        t = unit
    if t >= max(unit, cap // 4):
        return t, m_u                            # divisor tile: padding < unit rows
    return cap, _round_up(m, cap)                # prime-ish m: bounded over-pad (< cap rows)


# ---------------------------------------------------------------------------
# Kernels.  grid = (M//tm, N//tn, K//tk); reduction axis (k) is last.
# x block: (tm, tk), weight block (pre-transposed (K,N) layout): (tk, tn), bias block: (1, tn) f32.
# ---------------------------------------------------------------------------

def _make_linear_kernel(has_bias: bool, use_scratch: bool):
    def _dot(x, w):
        return lax.dot_general(
            x, w,
            dimension_numbers=(((1,), (0,)), ((), ())),   # standard (tm,tk)@(tk,tn)
            preferred_element_type=jnp.float32,
        )

    if not use_scratch:
        # float32 output: accumulate directly into the resident output block (no scratch).
        if has_bias:
            def kernel(x_ref, w_ref, b_ref, o_ref):
                @pl.when(pl.program_id(2) == 0)
                def _():
                    o_ref[...] = jnp.broadcast_to(b_ref[...], o_ref.shape)
                o_ref[...] += _dot(x_ref[...], w_ref[...])
        else:
            def kernel(x_ref, w_ref, o_ref):
                @pl.when(pl.program_id(2) == 0)
                def _():
                    o_ref[...] = jnp.zeros_like(o_ref)
                o_ref[...] += _dot(x_ref[...], w_ref[...])
    else:
        # Narrow output dtypes: f32 VMEM accumulator, bias (f32) + cast fused in the epilogue.
        if has_bias:
            def kernel(x_ref, w_ref, b_ref, o_ref, acc_ref):
                k = pl.program_id(2)

                @pl.when(k == 0)
                def _():
                    acc_ref[...] = jnp.zeros_like(acc_ref)

                acc_ref[...] += _dot(x_ref[...], w_ref[...])

                @pl.when(k == pl.num_programs(2) - 1)
                def _():
                    o_ref[...] = (acc_ref[...] + b_ref[...]).astype(o_ref.dtype)
        else:
            def kernel(x_ref, w_ref, o_ref, acc_ref):
                k = pl.program_id(2)

                @pl.when(k == 0)
                def _():
                    acc_ref[...] = jnp.zeros_like(acc_ref)

                acc_ref[...] += _dot(x_ref[...], w_ref[...])

                @pl.when(k == pl.num_programs(2) - 1)
                def _():
                    o_ref[...] = acc_ref[...].astype(o_ref.dtype)
    return kernel


# ---------------------------------------------------------------------------
# Wrapper
# ---------------------------------------------------------------------------

def linear_norm_forward(x, weight_t, bias=None, *, tm=None, tn=None, tk=None):
    """y = x @ weight_t (+ bias).

    x:        (..., K)
    weight_t: (K, N) -- the PyTorch (N, K) weight pre-transposed ONCE
              (see prepare_linear_norm_params / init_linear_norm_params).
    bias:     (N,) or None.
    User-supplied tn/tk must divide N/K exactly (or equal them); tm may imply row padding of x.
    """
    *lead, K = x.shape
    K_w, N = weight_t.shape
    if K_w != K:
        raise ValueError(f"weight_t must have shape (K, N); got K={K_w}, expected {K}")
    M = int(math.prod(lead)) if lead else 1

    out_dtype = x.dtype
    x_item = jnp.dtype(x.dtype).itemsize
    w_item = jnp.dtype(weight_t.dtype).itemsize
    out_item = jnp.dtype(out_dtype).itemsize
    sub_m = max(_sublane_unit(x.dtype), _sublane_unit(out_dtype))

    has_bias = bias is not None
    use_resident_f32 = (out_dtype == jnp.float32)

    # ---- tile selection ---------------------------------------------------
    if tn is None:
        tn = _pick_lane_tile(N, 512)
    elif not ((tn % 128 == 0 and N % tn == 0) or tn == N):
        raise ValueError(f"tn={tn} must be a 128-multiple divisor of N={N} (or equal N)")
    if tk is None:
        tk = _pick_lane_tile(K, 2048 if K >= 2048 else 1024)
    elif not ((tk % 128 == 0 and K % tk == 0) or tk == K):
        raise ValueError(f"tk={tk} must be a 128-multiple divisor of K={K} (or equal K)")
    if tm is None:
        tm, M_pad = _pick_row_tile(M, sub_m, 512 if M >= 2048 else 256)
    else:
        if not (tm % sub_m == 0 or tm == M):
            raise ValueError(f"tm={tm} must be a multiple of {sub_m} (or equal M={M})")
        M_pad = _round_up(M, tm)

    # ---- VMEM budget (generation-aware) ------------------------------------
    def _vmem_needed(tm_, tn_, tk_):
        return (2 * tm_ * tk_ * x_item            # x tile, double-buffered
                + 2 * tk_ * tn_ * w_item          # weight tile, double-buffered
                + 2 * tm_ * tn_ * out_item        # output tile, double-buffered
                + (0 if use_resident_f32 else tm_ * tn_ * 4)
                + (2 * 8 * tn_ * 4 if has_bias else 0))

    try:
        vmem_cap = int(pltpu.get_tpu_info().vmem_capacity_bytes)
    except Exception:
        vmem_cap = 64 << 20                       # conservative: v7x per-TC capacity
    vmem_budget = vmem_cap - (8 << 20)

    while _vmem_needed(tm, tn, tk) > vmem_budget:
        if tk % 256 == 0:
            tk //= 2
        elif tn % 256 == 0:
            tn //= 2
        elif tm % (2 * sub_m) == 0:
            tm //= 2
        else:
            # TODO(synk): per-call K/N 128-padding fallback for huge non-128-multiple dims.
            raise ValueError("LinearNorm tile working set does not fit in VMEM for this shape")

    # Give the megacore (v7x: 2 TensorCores) at least two parallel grid steps.
    while (M_pad // tm) * (N // tn) < 2:
        if tn % 256 == 0:
            tn //= 2
        elif tm % (2 * sub_m) == 0:
            tm //= 2
        else:
            break

    # ---- operands -----------------------------------------------------------
    x2d = x.reshape(M, K)
    if M_pad != M:
        x2d = jnp.pad(x2d, ((0, M_pad - M), (0, 0)))   # bounded row padding only

    operands = [x2d, weight_t]
    in_specs = [
        pl.BlockSpec((tm, tk), lambda i, j, k: (i, k)),   # x tile
        pl.BlockSpec((tk, tn), lambda i, j, k: (k, j)),   # weight tile, (K, N) layout
    ]
    if has_bias:
        b2d = bias.reshape(1, N).astype(jnp.float32)      # keep f32 end-to-end (no double rounding)
        operands.append(b2d)
        in_specs.append(pl.BlockSpec((1, tn), lambda i, j, k: (0, j)))

    grid = (M_pad // tm, N // tn, K // tk)
    gi, gj, gk = grid

    kernel = _make_linear_kernel(has_bias, use_scratch=not use_resident_f32)
    scratch = [] if use_resident_f32 else [pltpu.VMEM((tm, tn), jnp.float32)]

    bytes_accessed = (M_pad * K * x_item) * gj + (K * N * w_item) * gi + M_pad * N * out_item
    if has_bias:
        bytes_accessed += N * 4 * gi
    cost = pl.CostEstimate(
        flops=2 * M_pad * N * K, transcendentals=0, bytes_accessed=int(bytes_accessed))

    vmem_needed = _vmem_needed(tm, tn, tk)
    vmem_limit = int(min(vmem_budget, max(32 << 20, 2 * vmem_needed)))

    out2d = pl.pallas_call(
        kernel,
        out_shape=jax.ShapeDtypeStruct((M_pad, N), out_dtype),
        grid_spec=pltpu.PrefetchScalarGridSpec(
            num_scalar_prefetch=0,
            grid=grid,
            in_specs=in_specs,
            out_specs=pl.BlockSpec((tm, tn), lambda i, j, k: (i, j)),
            scratch_shapes=scratch,
        ),
        compiler_params=pltpu.CompilerParams(
            dimension_semantics=("parallel", "parallel", "arbitrary"),
            vmem_limit_bytes=vmem_limit,
        ),
        cost_estimate=cost,
    )(*operands)

    if M_pad != M:
        out2d = out2d[:M]
    return out2d.reshape(*lead, N)


# ---------------------------------------------------------------------------
# Parameter helpers (one-time; keep the weight in (K, N) layout off the hot path)
# ---------------------------------------------------------------------------

def init_linear_norm_params(key, in_features, out_features, bias=False, dtype=jnp.float32):
    """xavier_uniform_ weight (PyTorch bound sqrt(6/(fan_in+fan_out))), generated directly in the
    pre-transposed (in_features, out_features) layout the kernel consumes; zero f32 bias if asked."""
    bound = math.sqrt(6.0 / (in_features + out_features))
    weight_t = jax.random.uniform(
        key, (in_features, out_features), dtype=dtype, minval=-bound, maxval=bound)
    b = jnp.zeros((out_features,), dtype=jnp.float32) if bias else None
    return weight_t, b


def prepare_linear_norm_params(weight, bias=None):
    """Convert a PyTorch-layout weight (out_features, in_features) once: transpose to (K, N) and
    promote the bias to float32.  Do this at load time, not per forward call."""
    weight_t = jnp.asarray(weight).T
    b = None if bias is None else jnp.asarray(bias).astype(jnp.float32)
    return weight_t, b


# ---------------------------------------------------------------------------
# Demo / self-test
# ---------------------------------------------------------------------------

if __name__ == "__main__":
    key = jax.random.PRNGKey(0)
    k_x, k_w, k_b, k_x2, k_w2 = jax.random.split(key, 5)

    batch, seq, in_features, out_features = 2, 8, 32, 64
    x = jax.random.normal(k_x, (batch, seq, in_features), dtype=jnp.float32)

    # --- no-bias path (module default), resident-f32 output kernel ---
    w_t, b_none = init_linear_norm_params(k_w, in_features, out_features, bias=False)
    y = jax.block_until_ready(linear_norm_forward(x, w_t, b_none))
    y_ref = jnp.einsum("bsk,kn->bsn", x, w_t)
    assert y.shape == (batch, seq, out_features)
    assert jnp.allclose(y, y_ref, atol=1e-4, rtol=1e-4)

    # --- prepare path: PyTorch (N, K) layout converted once ---
    w_t_check, _ = prepare_linear_norm_params(w_t.T, None)
    assert jnp.array_equal(w_t_check, w_t)

    # --- bias path (module inits bias to 0; use a non-zero bias to exercise the fusion) ---
    bias_nz = 0.1 * jax.random.normal(k_b, (out_features,), dtype=jnp.float32)
    y_b = jax.block_until_ready(linear_norm_forward(x, w_t, bias_nz))
    y_b_ref = y_ref + bias_nz[None, None, :]
    assert jnp.allclose(y_b, y_b_ref, atol=1e-4, rtol=1e-4)

    # --- bf16 path exercises the f32 scratch-accumulator kernel (sublane unit becomes 16) ---
    y16 = jax.block_until_ready(
        linear_norm_forward(x.astype(jnp.bfloat16), w_t.astype(jnp.bfloat16)))
    assert y16.dtype == jnp.bfloat16
    assert jnp.allclose(y16.astype(jnp.float32), y_ref, atol=5e-2, rtol=5e-2)

    # --- multi-tile grid: exercises k-accumulation and a >=2-step parallel grid ---
    M2, K2, N2 = 128, 256, 256
    x2 = jax.random.normal(k_x2, (M2, K2), dtype=jnp.float32)
    w2_t, _ = init_linear_norm_params(k_w2, K2, N2, bias=False)
    y2 = jax.block_until_ready(linear_norm_forward(x2, w2_t, None, tm=64, tn=128, tk=128))
    y2_ref = x2 @ w2_t
    assert jnp.allclose(y2, y2_ref, atol=2e-2, rtol=2e-2)

    print("KERNEL_OK")
</pallas_src>

<mosaic_0001>
module attributes {stable_mosaic.version = 11 : i64} {
  func.func @kernel(%arg0: i32, %arg1: i32, %arg2: i32, %arg3: memref<8x32xf32, #tpu.memory_space<vmem>>, %arg4: memref<32x64xf32, #tpu.memory_space<vmem>>, %arg5: memref<8x64xf32, #tpu.memory_space<vmem>>) attributes {dimension_semantics = [#tpu.dimension_semantics<parallel>, #tpu.dimension_semantics<parallel>, #tpu.dimension_semantics<arbitrary>], iteration_bounds = array<i64: 2, 1, 1>, scalar_prefetch = 0 : i64, scratch_operands = 0 : i64, tpu.core_type = #tpu.core_type<tc>, window_params = [{transform_indices = @transform_0, window_bounds = array<i64: 8, 32>}, {transform_indices = @transform_1, window_bounds = array<i64: 32, 64>}, {transform_indices = @transform_2, window_bounds = array<i64: 8, 64>}]} {
    %c0_i32 = arith.constant 0 : i32
    %0 = arith.cmpi eq, %arg2, %c0_i32 : i32
    %1 = arith.extui %0 : i1 to i32
    %c0_i32_0 = arith.constant 0 : i32
    %2 = arith.cmpi ne, %1, %c0_i32_0 : i32
    scf.if %2 {
      %cst_8 = arith.constant 0.000000e+00 : f32
      %9 = vector.broadcast %cst_8 : f32 to vector<8x64xf32>
      %c0_9 = arith.constant 0 : index
      %c0_10 = arith.constant 0 : index
      %10 = vector.load %arg5[%c0_9, %c0_10] : memref<8x64xf32, #tpu.memory_space<vmem>>, vector<8x64xf32>
      tpu.vector_store %arg5[%c0_9, %c0_10], %9 {strides = array<i32>} : memref<8x64xf32, #tpu.memory_space<vmem>>, vector<8x64xf32>,
    } else {
    }
    %c0 = arith.constant 0 : index
    %c0_1 = arith.constant 0 : index
    %3 = vector.load %arg5[%c0, %c0_1] : memref<8x64xf32, #tpu.memory_space<vmem>>, vector<8x64xf32>
    %c0_2 = arith.constant 0 : index
    %c0_3 = arith.constant 0 : index
    %4 = vector.load %arg3[%c0_2, %c0_3] : memref<8x32xf32, #tpu.memory_space<vmem>>, vector<8x32xf32>
    %c0_4 = arith.constant 0 : index
    %c0_5 = arith.constant 0 : index
    %5 = vector.load %arg4[%c0_4, %c0_5] : memref<32x64xf32, #tpu.memory_space<vmem>>, vector<32x64xf32>
    %cst = arith.constant dense<0.000000e+00> : vector<8x64xf32>
    %6 = tpu.matmul %4, %5, %cst {dimension_numbers = #tpu.dot_dimension_numbers<[1], [0], [0], [1], [0, 0, 1, 1], [], []>} : vector<8x32xf32>, vector<32x64xf32>, vector<8x64xf32> -> vector<8x64xf32>
    %7 = arith.addf %3, %6 : vector<8x64xf32>
    %c0_6 = arith.constant 0 : index
    %c0_7 = arith.constant 0 : index
    %8 = vector.load %arg5[%c0_6, %c0_7] : memref<8x64xf32, #tpu.memory_space<vmem>>, vector<8x64xf32>
    tpu.vector_store %arg5[%c0_6, %c0_7], %7 {strides = array<i32>} : memref<8x64xf32, #tpu.memory_space<vmem>>, vector<8x64xf32>,
    return
  }
  func.func @transform_0(%arg0: i32, %arg1: i32, %arg2: i32) -> (i32, i32) {
    %c0_i32 = arith.constant 0 : i32
    return %arg0, %arg2 : i32, i32
  }
  func.func @transform_1(%arg0: i32, %arg1: i32, %arg2: i32) -> (i32, i32) {
    %c0_i32 = arith.constant 0 : i32
    return %arg2, %arg1 : i32, i32
  }
  func.func @transform_2(%arg0: i32, %arg1: i32, %arg2: i32) -> (i32, i32) {
    %c0_i32 = arith.constant 0 : i32
    return %arg0, %arg1 : i32, i32
  }
}

</mosaic_0001>

<bundles_post_ra>
// kernel: tpu_custom_call.1
= control target key start
LH: loop header
LB: loop body
LE: loop exit
PB: predicated region body
PF: predicated region fallthrough
CT: control target
= control target key end

     0   :  { %7 = vsyncpa [#allocation3], 0  ;;  %s857_s0 = inlined_call_operand.hbm [shape: f32[16,32], index: 0, kind: input, shape index: {}]   ;;  %s858_s1 = inlined_call_operand.hbm [shape: f32[32,64], index: 1, kind: input, shape index: {}]   ;;  %s859_s2 = inlined_call_operand.hbm [shape: f32[16,64], index: 2, kind: output, shape index: {}]  }
   0x1   :  { %9 = vsyncpa [#allocation3 + $0x1], 0 }
   0x2   :  { %10 = vsyncpa [#allocation6], 0 }
   0x3   :  { %11 = vsyncpa [#allocation4], 0 }
   0x4   :  { %13 = vsyncpa [#allocation4 + $0x1], 0  ;;  %s682_s9 = smov 0   ;;  %s684_s10 = smov 0  }
   0x5   :  { %s686_s11 = smov 0   ;;  %s688_s12 = smov 0  }
   0x6   :  { %s690_s13 = smov 0   ;;  %s692_s14 = smov 0  }
   0x7 LB: > { %s411_s15 = sadd.s32 4294967295, %s658_s14   ;;  %s412_s16 = sadd.s32 4294967294, %s658_s14   ;;  %s658_s14 = sphi %s692_s14, %s19_s14   ;;  %s654_s13 = sphi %s690_s13, %s877_s13   ;;  %s650_s12 = sphi %s688_s12, %s876_s12   ;;  %s646_s11 = sphi %s686_s11, %s875_s11   ;;  %s642_s10 = sphi %s684_s10, %s874_s10   ;;  %s638_s9 = sphi %s682_s9, %s873_s9  }
   0x8   : > { %p60_p0 = scmp.ne.s32.totalorder %s642_s10, %s638_s9  ;;  %p716_p1 = scmp.eq.s32.totalorder %s411_s15, 0 }
   0x9   : > { %p720_p2 = scmp.eq.s32.totalorder %s411_s15, 1  ;;  %p120_p3 = scmp.eq.s32.totalorder %s412_s16, 1 }
   0xa   : > { %p726_p4 = por %p716_p1, %p60_p0  ;;  %p413_p5 = scmp.ge.s32.totalorder %s658_s14, 1 }
   0xb   : > { %p731_p6 = por %p120_p3, %p60_p0  ;;  %p127_p7 = scmp.lt.s32.totalorder %s658_s14, 3 }
   0xc   : > { %s863_s19 = scalar_select %p726_p4, 1, 0 }
   0xd   : > { %s864_s20 = scalar_select %p731_p6, 1, 0 }
   0xe   : > { %p736_p8 = pnand %p413_p5, %p127_p7  ;;  %s660_s22 = smov [#allocation5]  }
   0xf   : > { %s143_s23 = sshll.u32 %s660_s22, 4  ;;  %s38_s25 = sadd.s32 1, %s654_s13  ;;  %s144_s23 = int_to_ptr.vmem [resolvable:$true] %s143_s23 }
  0x10   : > { %p451_p9 = pneg %p736_p8  ;;  %s531_s26 = scalar_lea.vmem %s144_s23, 512 }
  0x11   : > { %p532_p13 = scmp.ne.s32.totalorder %s144_s23, %s531_s26  ;;  %p539_p5 = scmp.lt.s32.totalorder %s144_s23, %s144_s23 }
  0x12   : > { %p745_p11 = pnand %p451_p9, %p716_p1  ;;  %p540_p7 = scmp.lt.s32.totalorder %s531_s26, %s531_s26 }
  0x14   : > { %p522_p12 = pneg %p745_p11  ;;  %p541_p6 = por %p540_p7, %p539_p5 }
  0x16   : > { %p534_p0 = pnand %p532_p13, %p522_p12 }
  0x18   : > { %p535_p3 = pneg %p534_p0 }
  0x1a   : > { %p542_p4 = pnand %p541_p6, %p535_p3 }
  0x1c   : > { %545 = shalt.err (!%p542_p4)
}
  0x1d   : > { %s661_s27 = smov 128   ;;  %s662_s28 = smov 8  }
  0x1e   : > { %454 = dma.hbm_to_vmem [thread:$0]  (!%p745_p11), %s858_s1, 512, %s144_s23, [#allocation6], %s661_s27, %s661_s27, %s662_s28  }
  0x1f   : > { %p40_p6 = scmp.ge.s32.totalorder %s38_s25, 2  ;;  %s47_s3 = sadd.s32 1, %s646_s11 }
  0x20   : > { %p54_p4 = scmp.ne.s32.totalorder %s646_s11, %s642_s10  ;;  %p55_p9 = scmp.eq.s32.totalorder %s658_s14, 0 }
  0x21   : > { %s879_s25 = smov (%p40_p6, %s38_s25), 0  ;;  %p464_p0 = scmp.lt.s32.totalorder %s658_s14, 2 }
  0x22   : > { %p763_p12 = por %p55_p9, %p54_p4  ;;  %p769_p13 = por %p720_p2, %p54_p4 }
  0x23   : > { %s42_s6 = ssub.s32 %s654_s13, %s879_s25  ;;  %s157_s7 = sand.u32 1, %s646_s11  }
  0x24   : > { %p45_p11 = scmp.eq.s32.totalorder %s42_s6, 0  ;;  %s416_s8 = sshll.u32 %s157_s7, 3 }
  0x25   : > { %s417_s16 = sshll.u32 %s654_s13, 7  ;;  %s161_s26 = scalar_lea.vmem [#allocation2], %s416_s8 }
  0x26   : > { %s778_s15 = scalar_select %p45_p11, %s646_s11, %s47_s3  }
  0x27   : > { %s167_s24 = scalar_lea.hbm %s857_s0, %s417_s16  ;;  %s169_s27 = sshll.u32 %s161_s26, 4  ;;  %s170_s27 = int_to_ptr.vmem [resolvable:$true] %s169_s27 }
  0x28   : > { %p786_p2 = pnand %p464_p0, %p763_p12  ;;  %s158_s28 = scalar_lea.sflag [#allocation3], %s157_s7 }
  0x29   : > { %s559_s29 = scalar_lea.vmem %s170_s27, 128  ;;  %s663_s30 = smov [#allocation2]  }
  0x2a   : > { %p548_p3 = pneg %p786_p2  ;;  %p560_p5 = scmp.ne.s32.totalorder %s170_s27, %s559_s29 }
  0x2b   : > { %s564_s3 = sshll.u32 %s663_s30, 4  ;;  %s565_s3 = int_to_ptr.vmem [resolvable:$false] %s564_s3 }
  0x2c   : > { %p562_p7 = pnand %p560_p5, %p548_p3  ;;  %s566_s6 = scalar_lea.vmem %s565_s3, 256 }
  0x2d   : > { %p567_p4 = scmp.lt.s32.totalorder %s170_s27, %s565_s3  ;;  %p568_p9 = scmp.lt.s32.totalorder %s566_s6, %s559_s29 }
  0x2e   : > { %p563_p6 = pneg %p562_p7 }
  0x2f   : > { %p569_p11 = por %p568_p9, %p567_p4 }
  0x31   : > { %p570_p10 = pnand %p569_p11, %p563_p6 }
  0x33   : > { %573 = shalt.err (!%p570_p10)
}
  0x34   : > { %458 = dma.hbm_to_vmem [thread:$0]  (!%p786_p2), %s167_s24, 128, %s170_s27, %s158_s28  }
  0x35   : > { %178 = sbr.rel (%p736_p8) target bundleno = 278 (0x116), region = 28  ;;  %s797_s4 = sand.u32 (!%p736_p8), 1, %s642_s10  }
  0x36   : > { %s419_s7 = sshll.u32 (!%p736_p8), %s797_s4, 3  ;;  %s181_s8 = scalar_lea.sflag (!%p736_p8), [#allocation3], %s797_s4 }
  0x37   : > { %s184_s16 = scalar_lea.vmem (!%p736_p8), [#allocation2], %s419_s7  ;;  %p870_p12 = scmp.ne.s32.totalorder (!%p736_p8), %s863_s19, 0 }
  0x3a   : > { %625 = dma.done.wait (%p870_p12), %s181_s8, 128  }
  0x3b   : > { %627 = vsyncadd (%p870_p12), %s181_s8, 4294967168 }
  0x3c   : > { %629 = dma.done.wait (%p716_p1), [#allocation6], 512  }
  0x3d   : > { %631 = vsyncadd (%p716_p1), [#allocation6], 4294966784  ;;  %v664_v0 = vmov 0.0   ;;  %vm665_vm0 = vmmov 0   ;;  %vm214_vm1 = vcmask 523264   ;;  %s208_s21 = scalar_lea.vmem [#allocation7], %s419_s7 }
  0x3e   : > { %432 = vmatprep.subr.mxu0 %v664_v0  ;;  %440 = vmatprep.mubr.msk.f32.mxu0 %vm665_vm0, %v664_v0  ;;  %215 = vst.msk [vmem:[%s208_s21] sm:$0xff] %vm214_vm1, %v664_v0  ;;  %v221_v1 = vld [vmem:[#allocation5 + $0x18] sm:$0xff]  ;;  %v220_v2 = vld [vmem:[#allocation5 + $0x10] sm:$0xff]  ;;  %v219_v3 = vld [vmem:[#allocation5 + $0x8] sm:$0xff]  ;;  %vm222_vm2 = vcmask 261120   ;;  %s424_s17 = sshll.u32 %s650_s12, 7 }
  0x3f   : > { %433 = vmatpush3.msra.mxu0 %v221_v1  ;;  %v218_v4 = vld [vmem:[#allocation5] sm:$0xff]  ;;  %v217_v5 = vld [vmem:[%s184_s16] sm:$0xff]  ;;  %s314_s19 = sshll.u32 %s208_s21, 4  ;;  %s814_s24 = scalar_lea.hbm %s859_s2, %s424_s17  ;;  %s315_s19 = int_to_ptr.vmem [resolvable:$true] %s314_s19 }
  0x40   : > { %434 = vmatprep.subr.mxu0 %v664_v0  ;;  %s300_s26 = scalar_lea.sflag [#allocation4], %s797_s4  ;;  %s574_s27 = scalar_lea.vmem %s315_s19, 128 }
  0x41   : > { %435 = vmatpush3.msra.mxu0 %v220_v2  ;;  %p575_p1 = scmp.ne.s32.totalorder %s315_s19, %s574_s27  ;;  %s666_s18 = smov [#allocation7]  }
  0x42   : > { %436 = vmatprep.subr.mxu0 %v664_v0  ;;  %s578_s12 = sshll.u32 %s666_s18, 4  ;;  %s579_s12 = int_to_ptr.vmem [resolvable:$false] %s578_s12 }
  0x43   : > { %437 = vmatpush3.msra.mxu0 %v219_v3  ;;  %p576_p8 = pnand %p575_p1, %p769_p13  ;;  %s580_s28 = scalar_lea.vmem %s579_s12, 256 }
  0x44   : > { %438 = vmatprep.subr.mxu0 %v664_v0  ;;  %p581_p0 = scmp.lt.s32.totalorder %s315_s19, %s579_s12  ;;  %p582_p2 = scmp.lt.s32.totalorder %s580_s28, %s574_s27 }
  0x45   : > { %439 = vmatpush3.msra.mxu0 %v218_v4  ;;  %v216_v6 = vld [vmem:[%s208_s21] sm:$0xff]  ;;  %p577_p10 = pneg %p576_p8 }
  0x46   : > { %441 = vmatmul.mubr.msk.f32.vlgmr.msra.gmra.mxu0 %vm222_vm2, %v217_v5  ;;  %p583_p3 = por %p582_p2, %p581_p0 }
  0x48   : > { %p584_p5 = pnand %p583_p3, %p577_p10 }
 0x106   : > { %v292_v7 = vpop.f32.mrf.mxu0 }
 0x107   : > { %v296_v8 = vadd.f32 %v292_v7, %v216_v6 }
 0x108   : > { %v442_v9 = vpop.f32.mrf.mxu0 }
 0x109   : > { %298 = vst.msk [vmem:[%s208_s21] sm:$0xff] %vm214_vm1, %v296_v8 }
 0x10a   : > { %587 = shalt.err (!%p584_p5)
}
 0x10b   : > { %s588_s29 = scalar_lea.hbm %s814_s24, 128  ;;  %s592_s6 = scalar_lea.hbm %s859_s2, 256 }
 0x10c   : > { %p589_p7 = scmp.ne.s32.totalorder %s814_s24, %s588_s29  ;;  %p593_p9 = scmp.lt.s32.totalorder %s814_s24, %s859_s2 }
 0x10d   : > { %p594_p11 = scmp.lt.s32.totalorder %s592_s6, %s588_s29 }
 0x10e   : > { %p590_p6 = pnand %p589_p7, %p769_p13 }
 0x10f   : > { %p595_p12 = por %p594_p11, %p593_p9 }
 0x110   : > { %p591_p4 = pneg %p590_p6 }
 0x112   : > { %p596_p1 = pnand %p595_p12, %p591_p4 }
 0x114   : > { %599 = shalt.err (!%p596_p1)
}
 0x115   : > { %449 = dma.vmem_to_hbm [thread:$0]  (%p769_p13), %s315_s19, 128, %s814_s24, %s300_s26  }
 0x116 PF: > { %s326_s8 = sand.u32 1, %s638_s9   ;;  %p871_p8 = scmp.ne.s32.totalorder %s864_s20, 0 }
 0x117   : > { %p872_p10 = scmp.ge.s32.totalorder %s658_s14, 2  ;;  %s327_s16 = scalar_lea.sflag [#allocation4], %s326_s8 }
 0x119   : > { %p460_p0 = pnand %p872_p10, %p871_p8 }
 0x11b   : > { %p461_p2 = pneg %p460_p0 }
 0x11d   : > { %633 = dma.done.wait (%p461_p2), %s327_s16, 128  }
 0x11e   : > { %635 = vsyncadd (%p461_p2), %s327_s16, 4294967168  ;;  %s19_s14 = sadd.s32 1, %s658_s14   ;;  %s873_s9 = smov %s642_s10 }
 0x11f   : > { %p16_p3 = scmp.ge.s32.totalorder %s19_s14, 4   ;;  %s874_s10 = smov %s646_s11 }
 0x120   : > { %s875_s11 = smov %s778_s15  ;;  %s876_s12 = smov %s654_s13 }
 0x121   : > { %s877_s13 = smov %s879_s25  ;;  %18 = sbr.rel (!%p16_p3) target bundleno = 7 (0x7), region = 82 }
 0x126   :  { %332 = vsyncpa [#allocation3], 1 }
 0x127   :  { %334 = vsyncpa [#allocation3 + $0x1], 1 }
 0x128   :  { %335 = vsyncpa [#allocation6], 1 }
 0x129   :  { %336 = vsyncpa [#allocation4], 1 }
 0x12a   :  { %338 = vsyncpa [#allocation4 + $0x1], 1 }

</bundles_post_ra>
